<compile_context>
chip_gen: v7x
topology: tpu7x:2x2x1
jax: 0.10.0
libtpu: 0.0.40
codegen_flags: <defaults>
</compile_context>

<pallas_src>
import dataclasses
from functools import partial

import jax
import jax.numpy as jnp
from jax.experimental import pallas as pl
from jax.experimental.pallas import tpu as pltpu


@dataclasses.dataclass
class NestedTensor:
    tensors: jnp.ndarray
    mask: jnp.ndarray


# ---------------------------------------------------------------------------
# Pallas kernel
# ---------------------------------------------------------------------------
def _proj_kernel(x_ref, w_ref, o_ref):
    # MXU hot path: bf16 [TM, K] @ bf16 [K, Cout_pad] -> f32 accumulation; store only the
    # true Cout columns (o_ref block is the unpadded [TM, Cout]; Cout is a multiple of 8,
    # so the store is sublane-aligned).
    acc = jnp.dot(x_ref[...], w_ref[...], preferred_element_type=jnp.float32)
    o_ref[...] = acc[:, : o_ref.shape[-1]].astype(o_ref.dtype)


def _choose_tm(m, tm_max):
    """Largest M tile <= tm_max; multiple of 8 when < m; and >= 2 grid steps whenever m
    allows, so the 'parallel' axis can shard across v7x's two TensorCores."""
    if m <= 8:
        return m
    tm = min(tm_max, m)
    if tm == m:                         # would be a single grid step -> split in two
        half = (m + 1) // 2
        tm = min(((half + 7) // 8) * 8, m)
    return tm


# ---------------------------------------------------------------------------
# Wrappers
# ---------------------------------------------------------------------------
@partial(jax.jit, static_argnames=("stride", "tm_max"))
def _patch_project(x, weight, *, stride, tm_max=2048):
    """Synthetic endpoint: strided patch extraction + tiled Pallas MXU matmul. x is NCHW f32."""
    B, C, H, W = x.shape
    Ho, Wo = H // stride, W // stride
    K, Cout = weight.shape                       # K = C * stride * stride (unpadded)
    M = B * Ho * Wo

    # Early bf16 cast: the one materialized space-to-depth intermediate is bf16, and under
    # jit the cast fuses into the transpose (single HBM pass over the f32 image).
    patches = x.astype(jnp.bfloat16)
    patches = patches.reshape(B, C, Ho, stride, Wo, stride)
    patches = patches.transpose(0, 2, 4, 1, 3, 5).reshape(M, K)   # K order = (c, kh, kw)

    # Lane-pad only the (tiny, VMEM-resident) weight so the MXU N dim is 128-aligned.
    Cout_pad = ((Cout + 127) // 128) * 128
    w = jnp.pad(weight, ((0, 0), (0, Cout_pad - Cout))).astype(jnp.bfloat16)

    TM = _choose_tm(M, tm_max)

    cost = pl.CostEstimate(
        flops=2 * M * K * Cout_pad,
        transcendentals=0,
        bytes_accessed=M * K * 2 + K * Cout_pad * 2 + M * Cout * 4,
    )
    out = pl.pallas_call(
        _proj_kernel,
        out_shape=jax.ShapeDtypeStruct((M, Cout), jnp.float32),
        grid=(pl.cdiv(M, TM),),
        in_specs=[
            pl.BlockSpec((TM, K), lambda i: (i, 0)),
            pl.BlockSpec((K, Cout_pad), lambda i: (0, 0)),    # weight stays VMEM-resident
        ],
        out_specs=pl.BlockSpec((TM, Cout), lambda i: (i, 0)),
        compiler_params=pltpu.CompilerParams(
            dimension_semantics=("parallel",),
            vmem_limit_bytes=32 * 1024 * 1024,
        ),
        cost_estimate=cost,
    )(patches, w)

    # Unpadded reshape + transpose back to PyTorch-style NCHW (the only remaining post pass,
    # over unpadded f32 data).
    return out.reshape(B, Ho, Wo, Cout).transpose(0, 3, 1, 2)


def _interpolate_mask_nearest(mask_bool, out_hw):
    """Matches F.interpolate(m[None].float(), size=out_hw).to(torch.bool)[0] exactly.
    Nearest-neighbor resize is a gather, not a matmul -> plain XLA gather (per perf review)."""
    B, H, W = mask_bool.shape
    Ho, Wo = out_hw
    # PyTorch 'nearest': src_index = floor(dst_index * in_size / out_size)
    idx_h = (jnp.arange(Ho) * H) // Ho
    idx_w = (jnp.arange(Wo) * W) // Wo
    return mask_bool[:, idx_h][:, :, idx_w]


# ---------------------------------------------------------------------------
# BackboneBase equivalent
# ---------------------------------------------------------------------------
class BackboneBase:
    """Pallas-TPU equivalent of BackboneBase.

    The real EfficientNet `body.extract_endpoints` has no clean single-kernel equivalent; it is
    replaced by a deterministic synthetic strided-patch linear projection per endpoint with the
    correct output channel counts (40 / 112) and strides (8 / 16)."""

    def __init__(self, reductions, in_channels=3, key=None):
        if key is None:
            key = jax.random.PRNGKey(0)
        self.reductions = list(reductions)
        self.reduction_map = {"reduction_3": 40, "reduction_4": 112}
        self.reduction_stride = {"reduction_3": 8, "reduction_4": 16}
        self.num_channels = [self.reduction_map[r] for r in self.reductions]
        self.weights = {}
        for i, r in enumerate(self.reductions):
            s = self.reduction_stride[r]
            fan_in = in_channels * s * s
            k = jax.random.fold_in(key, i)
            self.weights[r] = (
                jax.random.normal(k, (fan_in, self.reduction_map[r]), jnp.float32)
                / jnp.sqrt(float(fan_in))
            )

    def extract_endpoints(self, x):
        return {
            r: _patch_project(x, self.weights[r], stride=self.reduction_stride[r])
            for r in self.reductions
        }

    def __call__(self, tensor_list: NestedTensor):
        xs = self.extract_endpoints(tensor_list.tensors)
        out = {}
        for name in self.reductions:
            x = xs[name]
            m = tensor_list.mask
            assert m is not None
            mask = _interpolate_mask_nearest(m, tuple(x.shape[-2:]))
            out[name] = NestedTensor(x, mask)
        return out


# ---------------------------------------------------------------------------
# reference helpers (pure JAX) for numerical validation
# ---------------------------------------------------------------------------
def _ref_project(x, weight, stride):
    B, C, H, W = x.shape
    Ho, Wo = H // stride, W // stride
    p = x.reshape(B, C, Ho, stride, Wo, stride).transpose(0, 2, 4, 1, 3, 5)
    p = p.reshape(B * Ho * Wo, C * stride * stride)
    o = p @ weight
    return o.reshape(B, Ho, Wo, -1).transpose(0, 3, 1, 2)


if __name__ == "__main__":
    key = jax.random.PRNGKey(0)
    k_img, _ = jax.random.split(key)

    B, C, H, W = 2, 3, 32, 32
    images = jax.random.normal(k_img, (B, C, H, W), jnp.float32)

    # padding mask: True where padded (right / bottom regions), like DETR NestedTensor
    cols = jnp.arange(W)[None, None, :]
    rows = jnp.arange(H)[None, :, None]
    valid_w = jnp.array([32, 20])[:, None, None]
    valid_h = jnp.array([32, 24])[:, None, None]
    mask = (cols >= valid_w) | (rows >= valid_h)  # [B, H, W] bool

    tensor_list = NestedTensor(images, mask)
    backbone = BackboneBase(["reduction_3", "reduction_4"])

    out = backbone(tensor_list)
    for name, nt in out.items():
        jax.block_until_ready(nt.tensors)
        jax.block_until_ready(nt.mask)

    # shape / dtype checks
    assert out["reduction_3"].tensors.shape == (B, 40, H // 8, W // 8)
    assert out["reduction_3"].mask.shape == (B, H // 8, W // 8)
    assert out["reduction_3"].mask.dtype == jnp.bool_
    assert out["reduction_4"].tensors.shape == (B, 112, H // 16, W // 16)
    assert out["reduction_4"].mask.shape == (B, H // 16, W // 16)
    assert out["reduction_4"].mask.dtype == jnp.bool_

    # numerical checks vs pure-JAX reference (bf16 MXU inputs -> small quantization error)
    for name in backbone.reductions:
        s = backbone.reduction_stride[name]
        ref_feat = _ref_project(images, backbone.weights[name], s)
        diff = jnp.max(jnp.abs(out[name].tensors - ref_feat))
        assert float(diff) < 0.2, f"{name}: projection mismatch {float(diff)}"

        # H, W divisible by the stride -> nearest interpolation == strided subsampling
        ref_mask = mask[:, ::s, ::s]
        assert bool(jnp.all(out[name].mask == ref_mask)), f"{name}: mask mismatch"

    print("KERNEL_OK")
</pallas_src>

<mosaic_0001>
module attributes {stable_mosaic.version = 11 : i64} {
  func.func @_proj_kernel(%arg0: i32, %arg1: memref<16x192xbf16, #tpu.memory_space<vmem>>, %arg2: memref<192x128xbf16, #tpu.memory_space<vmem>>, %arg3: memref<16x40xf32, #tpu.memory_space<vmem>>) attributes {dimension_semantics = [#tpu.dimension_semantics<parallel>], iteration_bounds = array<i64: 2>, scalar_prefetch = 0 : i64, scratch_operands = 0 : i64, tpu.core_type = #tpu.core_type<tc>, window_params = [{transform_indices = @transform_0, window_bounds = array<i64: 16, 192>}, {pipeline_mode = #tpu.pipeline_mode<synchronous>, transform_indices = @transform_1, window_bounds = array<i64: 192, 128>}, {transform_indices = @transform_2, window_bounds = array<i64: 16, 40>}]} {
    %c0 = arith.constant 0 : index
    %c0_0 = arith.constant 0 : index
    %0 = vector.load %arg1[%c0, %c0_0] : memref<16x192xbf16, #tpu.memory_space<vmem>>, vector<16x192xbf16>
    %c0_1 = arith.constant 0 : index
    %c0_2 = arith.constant 0 : index
    %1 = vector.load %arg2[%c0_1, %c0_2] : memref<192x128xbf16, #tpu.memory_space<vmem>>, vector<192x128xbf16>
    %cst = arith.constant dense<0.000000e+00> : vector<16x128xf32>
    %2 = tpu.matmul %0, %1, %cst {dimension_numbers = #tpu.dot_dimension_numbers<[1], [0], [0], [1], [0, 0, 1, 1], [], []>} : vector<16x192xbf16>, vector<192x128xbf16>, vector<16x128xf32> -> vector<16x128xf32>
    %3 = vector.extract_strided_slice %2 {offsets = [0, 0], sizes = [16, 40], strides = [1, 1]} : vector<16x128xf32> to vector<16x40xf32>
    %c0_3 = arith.constant 0 : index
    %c0_4 = arith.constant 0 : index
    %4 = vector.load %arg3[%c0_3, %c0_4] : memref<16x40xf32, #tpu.memory_space<vmem>>, vector<16x40xf32>
    tpu.vector_store %arg3[%c0_3, %c0_4], %3 {strides = array<i32>} : memref<16x40xf32, #tpu.memory_space<vmem>>, vector<16x40xf32>,
    return
  }
  func.func @transform_0(%arg0: i32) -> (i32, i32) {
    %c0_i32 = arith.constant 0 : i32
    %c0_i32_0 = arith.constant 0 : i32
    return %arg0, %c0_i32 : i32, i32
  }
  func.func @transform_1(%arg0: i32) -> (i32, i32) {
    %c0_i32 = arith.constant 0 : i32
    %c0_i32_0 = arith.constant 0 : i32
    %c0_i32_1 = arith.constant 0 : i32
    return %c0_i32, %c0_i32_0 : i32, i32
  }
  func.func @transform_2(%arg0: i32) -> (i32, i32) {
    %c0_i32 = arith.constant 0 : i32
    %c0_i32_0 = arith.constant 0 : i32
    return %arg0, %c0_i32 : i32, i32
  }
}

</mosaic_0001>

<bundles_post_ra>
// kernel: _patch_project.1
= control target key start
LH: loop header
LB: loop body
LE: loop exit
PB: predicated region body
PF: predicated region fallthrough
CT: control target
= control target key end

     0   :  { %7 = vsyncpa [#allocation3], 0  ;;  %s688_s0 = inlined_call_operand.vmem [shape: bf16[32,192], index: 0, kind: input, shape index: {}]   ;;  %s689_s1 = inlined_call_operand.vmem [shape: bf16[192,128], index: 1, kind: input, shape index: {}]   ;;  %s690_s2 = inlined_call_operand.hbm [shape: f32[32,40], index: 2, kind: output, shape index: {}]  }
   0x1   :  { %9 = vsyncpa [#allocation3 + $0x1], 0  ;;  %s550_s9 = smov 0   ;;  %s552_s10 = smov 0  }
   0x2   :  { %s554_s11 = smov 0   ;;  %s556_s12 = smov 0  }
   0x3 LB: > { %s571_s13 = sadd.s32 4294967295, %s529_s12   ;;  %s380_s14 = sadd.s32 4294967294, %s529_s12   ;;  %s529_s12 = sphi %s556_s12, %s696_s12   ;;  %s525_s11 = sphi %s554_s11, %s695_s11   ;;  %s521_s10 = sphi %s552_s10, %s694_s10   ;;  %s517_s9 = sphi %s550_s9, %s693_s9  }
   0x4   : > { %s575_s15 = sadd.s32 1, %s529_s12   ;;  %s69_s16 = sadd.s32 1, %s525_s11 }
   0x5   : > { %s66_s17 = ssub.s32 %s529_s12, %s575_s15  ;;  %p79_p0 = scmp.ne.s32.totalorder %s525_s11, %s521_s10 }
   0x6   : > { %p67_p1 = scmp.eq.s32.totalorder %s66_s17, 0  ;;  %p80_p2 = scmp.eq.s32.totalorder %s571_s13, 1 }
   0x7   : > { %p85_p3 = scmp.ne.s32.totalorder %s521_s10, %s517_s9  ;;  %p86_p4 = scmp.eq.s32.totalorder %s380_s14, 1 }
   0x8   : > { %s586_s18 = scalar_select %p67_p1, %s525_s11, %s69_s16  }
   0x9   : > { %p588_p5 = por %p80_p2, %p79_p0  ;;  %p592_p6 = por %p86_p4, %p85_p3 }
   0xa   : > { %p383_p7 = scmp.ge.s32.totalorder %s529_s12, 1  ;;  %p117_p8 = scmp.lt.s32.totalorder %s529_s12, 3 }
   0xc   : > { %p118_p9 = pnand %p383_p7, %p117_p8 }
   0xd   : > { %v452_v0 = vld [vmem:[%s689_s1] sm:$0xff] (!%p118_p9)   ;;  %v531_v1 = vmov (!%p118_p9), 0   ;;  %s385_s23 = sshll.u32 (!%p118_p9), %s571_s13, 1  ;;  %v453_v2 = vld [vmem:[%s689_s1 + $0x8] sm:$0xff] (!%p118_p9)   ;;  %v454_v3 = vld [vmem:[%s689_s1 + $0x10] sm:$0xff] (!%p118_p9)   ;;  %vm256_vm0 = vcmask (!%p118_p9), 523264  }
   0xe   : > { %121 = sbr.rel (%p118_p9) target bundleno = 291 (0x123), region = 28  ;;  %260 = vmatprep.subr.bf16.mxu0 (!%p118_p9), %v531_v1  ;;  %p141_p10 = scmp.lt.s32.totalorder (!%p118_p9), %s385_s23, 3  ;;  %v455_v4 = vld [vmem:[%s689_s1 + $0x18] sm:$0xff] (!%p118_p9)   ;;  %v456_v6 = vld [vmem:[%s689_s1 + $0x20] sm:$0xff] (!%p118_p9)   ;;  %v457_v7 = vld [vmem:[%s689_s1 + $0x28] sm:$0xff] (!%p118_p9)   ;;  %vm301_vm1 = vcmask (!%p118_p9), 326656  }
   0xf   : > { %261 = vmatpush1.bf16.msra.mxu0 (!%p118_p9), %v452_v0  ;;  %v458_v8 = vld [vmem:[%s689_s1 + $0x30] sm:$0xff] (!%p118_p9)   ;;  %v459_v9 = vld [vmem:[%s689_s1 + $0x38] sm:$0xff] (!%p118_p9)   ;;  %v460_v10 = vld [vmem:[%s689_s1 + $0x40] sm:$0xff] (!%p118_p9)   ;;  %s137_s3 = sand.u32 (!%p118_p9), 1, %s521_s10   ;;  %s409_s8 = sshll.u32 (!%p118_p9), %s571_s13, 8 }
  0x10   : > { %262 = vmatprep.subr.bf16.mxu0 (!%p118_p9), %v531_v1  ;;  %v461_v11 = vld [vmem:[%s689_s1 + $0x48] sm:$0xff] (!%p118_p9)   ;;  %v462_v12 = vld [vmem:[%s689_s1 + $0x50] sm:$0xff] (!%p118_p9)   ;;  %v463_v13 = vld [vmem:[%s689_s1 + $0x58] sm:$0xff] (!%p118_p9)   ;;  %s384_s4 = sshll.u32 (!%p118_p9), %s137_s3, 4  ;;  %s645_s17 = scalar_lea.hbm (!%p118_p9), %s690_s2, %s409_s8 }
  0x11   : > { %s139_s6 = scalar_lea.vmem (!%p118_p9), [#allocation2], %s384_s4  ;;  %s532_s21 = smov (!%p118_p9), [#allocation2]  }
  0x12   : > { %s318_s7 = sshll.u32 (!%p118_p9), %s139_s6, 4  ;;  %s471_s22 = sshll.u32 (!%p118_p9), %s532_s21, 4  ;;  %s640_s7 = int_to_ptr.vmem [resolvable:$true] %s318_s7  ;;  %s472_s22 = int_to_ptr.vmem [resolvable:$false] %s471_s22 }
  0x13   : > { %263 = vmatpush1.bf16.msra.mxu0 (!%p118_p9), %v453_v2  ;;  %s467_s13 = scalar_lea.vmem (!%p118_p9), %s640_s7, 256  ;;  %p474_p0 = scmp.lt.s32.totalorder (!%p118_p9), %s640_s7, %s472_s22 }
  0x14   : > { %264 = vmatprep.subr.bf16.mxu0 (!%p118_p9), %v531_v1  ;;  %p468_p11 = scmp.ne.s32.totalorder (!%p118_p9), %s640_s7, %s467_s13 }
  0x15   : > { %s698_s23 = smov (!%p141_p10, %s385_s23), 3 }
  0x16   : > { %s408_s28 = sshll.u32 %s698_s23, 3  ;;  %p469_p12 = pnand %p468_p11, %p588_p5 }
  0x17   : > { %265 = vmatpush1.bf16.msra.mxu0 %v454_v3  ;;  %s145_s5 = scalar_lea.vmem %s688_s0, %s408_s28  ;;  %s473_s23 = scalar_lea.vmem %s472_s22, 512 }
  0x18   : > { %266 = vmatprep.subr.bf16.mxu0 %v531_v1  ;;  %v466_v5 = vld [vmem:[%s145_s5 + $0x4] ss:$8 sps:$4 sm:$0xff]   ;;  %v464_v14 = vld [vmem:[%s145_s5] ss:$8 sps:$4 sm:$0xff]   ;;  %s647_s5 = scalar_lea.sflag [#allocation3], %s137_s3  ;;  %p470_p13 = pneg %p469_p12 }
  0x19   : > { %402 = vmatprep.mubr.msk.bf16.mxu0 %vm256_vm0, %v466_v5  ;;  %p475_p1 = scmp.lt.s32.totalorder %s473_s23, %s467_s13 }
  0x1b   : > { %267 = vmatpush1.bf16.msra.mxu0 %v455_v4  ;;  %p476_p2 = por %p475_p1, %p474_p0 }
  0x1c   : > { %268 = vmatprep.subr.bf16.mxu0 %v531_v1 }
  0x1d   : > { %p477_p3 = pnand %p476_p2, %p470_p13 }
  0x1f   : > { %269 = vmatpush1.bf16.msra.mxu0 %v456_v6 }
  0x20   : > { %270 = vmatprep.subr.bf16.mxu0 %v531_v1 }
  0x23   : > { %271 = vmatpush1.bf16.msra.mxu0 %v457_v7 }
  0x24   : > { %272 = vmatprep.subr.bf16.mxu0 %v531_v1 }
  0x27   : > { %273 = vmatpush1.bf16.msra.mxu0 %v458_v8 }
  0x28   : > { %274 = vmatprep.subr.bf16.mxu0 %v531_v1 }
  0x2b   : > { %275 = vmatpush1.bf16.msra.mxu0 %v459_v9 }
  0x2c   : > { %276 = vmatprep.subr.bf16.mxu0 %v531_v1 }
  0x2f   : > { %277 = vmatpush1.bf16.msra.mxu0 %v460_v10 }
  0x30   : > { %278 = vmatprep.subr.bf16.mxu0 %v531_v1 }
  0x33   : > { %279 = vmatpush1.bf16.msra.mxu0 %v461_v11 }
  0x34   : > { %280 = vmatprep.subr.bf16.mxu0 %v531_v1 }
  0x37   : > { %281 = vmatpush1.bf16.msra.mxu0 %v462_v12 }
  0x38   : > { %282 = vmatprep.subr.bf16.mxu0 %v531_v1 }
  0x3b   : > { %283 = vmatpush1.bf16.msra.mxu0 %v463_v13 }
  0x3e   : > { %293 = vmatmul.mubr.bf16.vlgmr.msra.gmra.mrb[0].mxu0 %v464_v14 }
 0x111   : > { %v294_v15 = vpop.f32.mrb[0].mxu0 }
 0x112   : > { %302 = vst.msk [vmem:[%s139_s6] sm:$0xff] %vm301_vm1, %v294_v15  ;;  %v296_v16 = vpop.f32.mrb[1].mxu0 }
 0x113   : > { %v297_v17 = vpop.f32.mrb[2].mxu0 }
 0x114   : > { %303 = vst.msk [vmem:[%s139_s6 + $0x8] sm:$0xff] %vm301_vm1, %v297_v17  ;;  %v299_v18 = vpop.f32.mrb[3].mxu0 }
 0x115   : > { %480 = shalt.err (!%p477_p3)
}
 0x116   : > { %s481_s24 = scalar_lea.hbm %s645_s17, 256  ;;  %s485_s27 = scalar_lea.hbm %s690_s2, 512 }
 0x117   : > { %p482_p4 = scmp.ne.s32.totalorder %s645_s17, %s481_s24  ;;  %p486_p9 = scmp.lt.u32.totalorder %s645_s17, %s690_s2 }
 0x118   : > { %p487_p10 = scmp.lt.u32.totalorder %s485_s27, %s481_s24  ;;  %p489_p12 = scmp.lt.u32.totalorder %s481_s24, %s645_s17 }
 0x119   : > { %p483_p7 = pnand %p482_p4, %p588_p5 }
 0x11a   : > { %p488_p11 = por %p487_p10, %p486_p9 }
 0x11b   : > { %p484_p8 = pneg %p483_p7 }
 0x11c   : > { %p490_p13 = por %p489_p12, %p488_p11 }
 0x11e   : > { %p491_p0 = pnand %p490_p13, %p484_p8 }
 0x120   : > { %494 = shalt.err (!%p491_p0)
}
 0x121   : > { %s533_s30 = smov 128   ;;  %s534_s3 = smov 8  }
 0x122   : > { %410 = dma.vmem_to_hbm [thread:$0]  (%p588_p5), %s640_s7, 256, %s645_s17, %s647_s5, %s533_s30, %s533_s30, %s534_s3  }
 0x123 PF: > { %p416_p1 = scmp.ge.s32.totalorder %s529_s12, 2  ;;  %s333_s4 = sand.u32 1, %s517_s9  }
 0x124   : > { %s334_s6 = scalar_lea.sflag [#allocation3], %s333_s4 }
 0x125   : > { %p413_p2 = pnand %p416_p1, %p592_p6 }
 0x127   : > { %512 = dma.done.wait (!%p413_p2), %s334_s6, 256  }
 0x128   : > { %514 = vsyncadd (!%p413_p2), %s334_s6, 4294967040  ;;  %p12_p3 = scmp.ge.s32.totalorder %s575_s15, 4   ;;  %s693_s9 = smov %s521_s10 }
 0x129   : > { %s694_s10 = smov %s525_s11  ;;  %s695_s11 = smov %s586_s18 }
 0x12a   : > { %s696_s12 = smov %s575_s15  ;;  %14 = sbr.rel (!%p12_p3) target bundleno = 3 (0x3), region = 63 }
 0x131   :  { %339 = vsyncpa [#allocation3], 1 }
 0x132   :  { %341 = vsyncpa [#allocation3 + $0x1], 1 }

</bundles_post_ra>
